<compile_context>
chip_gen: v6e
topology: v6e:2x2x1
jax: 0.10.0
libtpu: 0.0.40
codegen_flags: <defaults>
</compile_context>

<pallas_src>
import math

import numpy as np

import jax
import jax.numpy as jnp
from jax.experimental import pallas as pl
from jax.experimental.pallas import tpu as pltpu


FIR_KERNEL = (1.0, 3.0, 3.0, 1.0)


# ----------------------------------------------------------------------------
# FIR -> banded resampling matrices
# ----------------------------------------------------------------------------

def _normalized_taps(fir_kernel):
    k = np.asarray(fir_kernel, dtype=np.float64)
    return k / k.sum()  # outer(kd, kd) == outer(k, k) / sum(outer(k, k))


def _down_matrices(H, W, fir_kernel):
    """L (Ho,H), R (W,Wo) such that L @ x @ R == stride-2 depthwise conv2d."""
    kd = _normalized_taps(fir_kernel)
    K = len(kd)
    ph = math.ceil(K / 2) - 1 if H % 2 == 0 else math.ceil((K + 1) / 2) - 1
    pw = math.ceil(K / 2) - 1 if W % 2 == 0 else math.ceil((K + 1) / 2) - 1
    Ho = (H + 2 * ph - K) // 2 + 1
    Wo = (W + 2 * pw - K) // 2 + 1
    L = np.zeros((Ho, H), np.float32)
    for i in range(Ho):
        for a in range(K):
            h = 2 * i + a - ph
            if 0 <= h < H:
                L[i, h] += kd[a]
    R = np.zeros((W, Wo), np.float32)
    for j in range(Wo):
        for b in range(K):
            w = 2 * j + b - pw
            if 0 <= w < W:
                R[w, j] += kd[b]
    return L, R


def _up_matrices(H, W, fir_kernel):
    """L (Ho,H), R (W,Wo): L @ x @ R == stride-2 depthwise conv_transpose2d(x, 4*k2)."""
    kd = _normalized_taps(fir_kernel)
    K = len(kd)
    g = 2.0 * kd  # 4*k2 == outer(2*kd, 2*kd)
    p = (K - 1) // 2
    Ho = (H - 1) * 2 - 2 * p + K
    Wo = (W - 1) * 2 - 2 * p + K
    L = np.zeros((Ho, H), np.float32)
    for i in range(Ho):
        for h in range(H):
            a = i + p - 2 * h
            if 0 <= a < K:
                L[i, h] += g[a]
    R = np.zeros((W, Wo), np.float32)
    for j in range(Wo):
        for w in range(W):
            b = j + p - 2 * w
            if 0 <= b < K:
                R[w, j] += g[b]
    return L, R


# ----------------------------------------------------------------------------
# Pallas kernel
# ----------------------------------------------------------------------------

def _sandwich_kernel(l_ref, r_ref, x_ref, o_ref, t_ref):
    """o[b] = L @ x[b] @ R for every packed plane in the block (MXU only).

    L pass: per-plane (tho,H)@(H,Wp) written straight into an f32 VMEM scratch
    (bounded live range).  R pass: one batched (bt*tho,Wp)@(Wp,Wop) matmul, so
    the MXU pipeline stays full and the store is a single lane-dense slab.
    """
    bt, _, Wp = x_ref.shape
    tho = l_ref.shape[0]
    Wop = r_ref.shape[1]
    L = l_ref[...]
    R = r_ref[...]

    def l_pass(b, carry):
        t_ref[b] = jnp.dot(L, x_ref[b], preferred_element_type=jnp.float32)
        return carry

    jax.lax.fori_loop(0, bt, l_pass, 0, unroll=True)

    if bt == 1:
        y = jnp.dot(t_ref[0], R, preferred_element_type=jnp.float32)
        o_ref[0] = y.astype(o_ref.dtype)
    else:
        y = jnp.dot(t_ref[...].reshape(bt * tho, Wp), R,
                    preferred_element_type=jnp.float32)
        o_ref[...] = y.reshape(bt, tho, Wop).astype(o_ref.dtype)


# ----------------------------------------------------------------------------
# Sizing heuristics
# ----------------------------------------------------------------------------

def _vmem_limit_bytes():
    """Scoped-VMEM request: ~75% of the part's VMEM, capped at 96 MiB."""
    cap = None
    try:
        cap = int(pltpu.get_tpu_info().vmem_capacity_bytes)
    except Exception:
        cap = None
    if not cap:
        cap = 64 * 1024 * 1024  # conservative (v7x-sized) fallback
    return min(int(cap * 0.75), 96 * 1024 * 1024)


def _pick_lane_pack(B, W, target=128):
    """Planes packed side-by-side along lanes (block-diagonal R) so the kernel's
    last dims are lane-dense even when W is small."""
    if W >= target or B == 1:
        return 1
    g_max = min(B, -(-target // W))  # ceil(target / W)
    g = 1
    for cand in range(1, g_max + 1):
        if B % cand == 0:
            g = cand
    if B // g < 2:
        # back off (but keep >=64 lanes) so the 'parallel' batch axis keeps
        # >=2 grid steps for the v7x megacore
        for cand in range(g - 1, 0, -1):
            if B % cand == 0 and B // cand >= 2 and cand * W >= 64:
                g = cand
                break
    return g


def _pick_tiles(B0, Ho, H, Wp, Wop, vmem_limit):
    """Pick (bt, tho): packed planes per grid step and output-row tile."""
    def plane_bytes(tho):
        # double-buffered input + output blocks and the f32 L-pass scratch,
        # per packed plane per grid step
        return 4 * (2 * H * Wp + 2 * tho * Wop + tho * Wp)

    # Row-tile candidates: Ho itself or a multiple-of-8 divisor (keeps the
    # (8,128) block rule without ragged tiles), largest first.
    cands = sorted({Ho} | {t for t in range(8, Ho + 1, 8) if Ho % t == 0},
                   reverse=True)
    # Budget ~half the scoped VMEM, minus the (double-buffered) L/R tiles.
    lr_bytes = 4 * 2 * (min(Ho, 512) * H + Wp * Wop)
    budget = max(vmem_limit // 2 - lr_bytes, 1 << 20)

    tho = cands[-1]
    for t in cands:
        if t <= 512 and plane_bytes(t) <= budget:
            tho = t
            break

    bt = max(1, min(B0, budget // max(plane_bytes(tho), 1)))
    if B0 >= 2:
        # keep >=2 steps on the 'parallel' batch axis (v7x megacore sharding)
        bt = max(1, min(bt, B0 // 2))
    while B0 % bt:
        bt -= 1
    return bt, tho


# ----------------------------------------------------------------------------
# pallas_call wrapper
# ----------------------------------------------------------------------------

def _run_sandwich(x3, L, R):
    """x3: (B0, H, Wp) packed planes; returns (B0, Ho, Wop), out[b] = L @ x3[b] @ R."""
    B0, H, Wp = x3.shape
    Ho = L.shape[0]
    Wop = R.shape[1]
    vmem_limit = _vmem_limit_bytes()
    bt, tho = _pick_tiles(B0, Ho, H, Wp, Wop, vmem_limit)
    grid = (B0 // bt, Ho // tho)
    cost = pl.CostEstimate(
        flops=2 * B0 * Ho * Wp * (H + Wop),
        transcendentals=0,
        bytes_accessed=4 * (B0 * (H * Wp + Ho * Wop) + Ho * H + Wp * Wop),
    )
    return pl.pallas_call(
        _sandwich_kernel,
        out_shape=jax.ShapeDtypeStruct((B0, Ho, Wop), x3.dtype),
        grid=grid,
        in_specs=[
            pl.BlockSpec((tho, H), lambda b, h: (h, 0)),        # L row tile
            pl.BlockSpec((Wp, Wop), lambda b, h: (0, 0)),       # (block-diag) R
            pl.BlockSpec((bt, H, Wp), lambda b, h: (b, 0, 0)),  # packed planes
        ],
        out_specs=pl.BlockSpec((bt, tho, Wop), lambda b, h: (b, h, 0)),
        scratch_shapes=[pltpu.VMEM((bt, tho, Wp), jnp.float32)],
        compiler_params=pltpu.CompilerParams(
            # batch axis parallel (megacore); h stays 'arbitrary' so the
            # constant x index_map's re-DMA skip is preserved on one core
            dimension_semantics=("parallel", "arbitrary"),
            vmem_limit_bytes=vmem_limit,
        ),
        cost_estimate=cost,
    )(L, R, x3)


def resample(x_nchw, up_or_down, fir_kernel=FIR_KERNEL):
    """JAX/Pallas equivalent of Resample(fir_kernel).forward(x, up_or_down)."""
    N, C, H, W = x_nchw.shape
    if up_or_down == 'down':
        L, R = _down_matrices(H, W, fir_kernel)
    elif up_or_down == 'up':
        L, R = _up_matrices(H, W, fir_kernel)
    else:
        raise ValueError(f'up_or_down must be up or down, got {up_or_down}')
    Ho, Wo = L.shape[0], R.shape[1]
    B = N * C
    x3 = x_nchw.reshape(B, H, W)  # free reshape: no transpose, W on lanes

    # Lane packing: put g planes side by side on the lane axis and use a g-fold
    # block-diagonal R; the un/packing transposes are cheap layout plumbing and
    # buy lane-dense input vregs + an unmasked lane-dense output store.
    g = _pick_lane_pack(B, W)
    if g > 1:
        xp = (x3.reshape(B // g, g, H, W)
                 .transpose(0, 2, 1, 3)
                 .reshape(B // g, H, g * W))
        Rg = np.zeros((g * W, g * Wo), np.float32)
        for j in range(g):
            Rg[j * W:(j + 1) * W, j * Wo:(j + 1) * Wo] = R
    else:
        xp, Rg = x3, R

    out = _run_sandwich(xp, jnp.asarray(L), jnp.asarray(Rg))

    if g > 1:
        out = (out.reshape(B // g, Ho, g, Wo)
                  .transpose(0, 2, 1, 3)
                  .reshape(B, Ho, Wo))
    return out.reshape(N, C, Ho, Wo)


# ----------------------------------------------------------------------------
# Reference + test
# ----------------------------------------------------------------------------

def _reference(x_nchw, up_or_down, fir_kernel=FIR_KERNEL):
    """Independent XLA reference (lax.conv_general_dilated), NCHW like PyTorch."""
    K = len(fir_kernel)
    k1 = jnp.asarray(fir_kernel, jnp.float32)
    k2 = jnp.outer(k1, k1)
    k2 = k2 / jnp.sum(k2)
    C = x_nchw.shape[1]
    H, W = x_nchw.shape[-2:]
    if up_or_down == 'down':
        ph = math.ceil(K / 2) - 1 if H % 2 == 0 else math.ceil((K + 1) / 2) - 1
        pw = math.ceil(K / 2) - 1 if W % 2 == 0 else math.ceil((K + 1) / 2) - 1
        w = jnp.tile(k2[None, None], (C, 1, 1, 1))
        return jax.lax.conv_general_dilated(
            x_nchw, w, window_strides=(2, 2), padding=[(ph, ph), (pw, pw)],
            dimension_numbers=('NCHW', 'OIHW', 'NCHW'), feature_group_count=C,
            precision=jax.lax.Precision.HIGHEST)
    else:
        p = (K - 1) // 2
        w = jnp.tile((4.0 * k2[::-1, ::-1])[None, None], (C, 1, 1, 1))
        return jax.lax.conv_general_dilated(
            x_nchw, w, window_strides=(1, 1),
            padding=[(K - 1 - p, K - 1 - p)] * 2, lhs_dilation=(2, 2),
            dimension_numbers=('NCHW', 'OIHW', 'NCHW'), feature_group_count=C,
            precision=jax.lax.Precision.HIGHEST)


if __name__ == "__main__":
    key = jax.random.PRNGKey(0)
    x = jax.random.normal(key, (2, 4, 16, 16), dtype=jnp.float32)  # NCHW

    # Tolerance note: the in-kernel f32 matmuls may be decomposed into bf16 MXU
    # passes depending on backend default precision; any real tap/offset bug
    # would produce O(1e-1) errors, so 2e-3 still catches everything.
    tol = dict(rtol=2e-3, atol=2e-3)

    # downsample: (2, 4, 16, 16) -> (2, 4, 8, 8)
    y_down = jax.block_until_ready(resample(x, 'down'))
    assert y_down.shape == (2, 4, 8, 8), y_down.shape
    assert jnp.allclose(y_down, _reference(x, 'down'), **tol)

    # upsample the downsampled result: (2, 4, 8, 8) -> (2, 4, 16, 16)
    y_up = jax.block_until_ready(resample(y_down, 'up'))
    assert y_up.shape == (2, 4, 16, 16), y_up.shape
    assert jnp.allclose(y_up, _reference(y_down, 'up'), **tol)

    print("KERNEL_OK")
</pallas_src>

<mosaic_0001>
module attributes {stable_mosaic.version = 11 : i64} {
  func.func @_sandwich_kernel(%arg0: i32, %arg1: i32, %arg2: memref<8x16xf32, #tpu.memory_space<vmem>>, %arg3: memref<64x32xf32, #tpu.memory_space<vmem>>, %arg4: memref<1x16x64xf32, #tpu.memory_space<vmem>>, %arg5: memref<1x8x32xf32, #tpu.memory_space<vmem>>, %arg6: memref<1x8x64xf32, #tpu.memory_space<vmem>>) attributes {dimension_semantics = [#tpu.dimension_semantics<parallel>, #tpu.dimension_semantics<arbitrary>], iteration_bounds = array<i64: 2, 1>, scalar_prefetch = 0 : i64, scratch_operands = 1 : i64, tpu.core_type = #tpu.core_type<tc>, window_params = [{transform_indices = @transform_0, window_bounds = array<i64: 8, 16>}, {pipeline_mode = #tpu.pipeline_mode<synchronous>, transform_indices = @transform_1, window_bounds = array<i64: 64, 32>}, {transform_indices = @transform_2, window_bounds = array<i64: 1, 16, 64>}, {transform_indices = @transform_3, window_bounds = array<i64: 1, 8, 32>}]} {
    %c0 = arith.constant 0 : index
    %c0_0 = arith.constant 0 : index
    %0 = vector.load %arg2[%c0, %c0_0] : memref<8x16xf32, #tpu.memory_space<vmem>>, vector<8x16xf32>
    %c0_1 = arith.constant 0 : index
    %c0_2 = arith.constant 0 : index
    %1 = vector.load %arg3[%c0_1, %c0_2] : memref<64x32xf32, #tpu.memory_space<vmem>>, vector<64x32xf32>
    %c0_i32 = arith.constant 0 : i32
    %2 = arith.index_cast %c0_i32 : i32 to index
    %c0_3 = arith.constant 0 : index
    %c0_4 = arith.constant 0 : index
    %3 = vector.load %arg4[%2, %c0_3, %c0_4] : memref<1x16x64xf32, #tpu.memory_space<vmem>>, vector<1x16x64xf32>
    %4 = vector.shape_cast %3 : vector<1x16x64xf32> to vector<16x64xf32>
    %cst = arith.constant dense<0.000000e+00> : vector<8x64xf32>
    %5 = tpu.matmul %0, %4, %cst {dimension_numbers = #tpu.dot_dimension_numbers<[1], [0], [0], [1], [0, 0, 1, 1], [], []>} : vector<8x16xf32>, vector<16x64xf32>, vector<8x64xf32> -> vector<8x64xf32>
    %6 = arith.index_cast %c0_i32 : i32 to index
    %c0_5 = arith.constant 0 : index
    %c0_6 = arith.constant 0 : index
    %7 = vector.load %arg6[%6, %c0_5, %c0_6] : memref<1x8x64xf32, #tpu.memory_space<vmem>>, vector<1x8x64xf32>
    %8 = vector.shape_cast %7 : vector<1x8x64xf32> to vector<8x64xf32>
    %9 = vector.shape_cast %5 : vector<8x64xf32> to vector<1x8x64xf32>
    tpu.vector_store %arg6[%6, %c0_5, %c0_6], %9 {strides = array<i32>} : memref<1x8x64xf32, #tpu.memory_space<vmem>>, vector<1x8x64xf32>,
    %c1_i32 = arith.constant 1 : i32
    %c0_7 = arith.constant 0 : index
    %c0_8 = arith.constant 0 : index
    %c0_9 = arith.constant 0 : index
    %10 = vector.load %arg6[%c0_7, %c0_8, %c0_9] : memref<1x8x64xf32, #tpu.memory_space<vmem>>, vector<1x8x64xf32>
    %11 = vector.shape_cast %10 : vector<1x8x64xf32> to vector<8x64xf32>
    %cst_10 = arith.constant dense<0.000000e+00> : vector<8x32xf32>
    %12 = tpu.matmul %11, %1, %cst_10 {dimension_numbers = #tpu.dot_dimension_numbers<[1], [0], [0], [1], [0, 0, 1, 1], [], []>} : vector<8x64xf32>, vector<64x32xf32>, vector<8x32xf32> -> vector<8x32xf32>
    %c0_11 = arith.constant 0 : index
    %c0_12 = arith.constant 0 : index
    %c0_13 = arith.constant 0 : index
    %13 = vector.load %arg5[%c0_11, %c0_12, %c0_13] : memref<1x8x32xf32, #tpu.memory_space<vmem>>, vector<1x8x32xf32>
    %14 = vector.shape_cast %13 : vector<1x8x32xf32> to vector<8x32xf32>
    %15 = vector.shape_cast %12 : vector<8x32xf32> to vector<1x8x32xf32>
    tpu.vector_store %arg5[%c0_11, %c0_12, %c0_13], %15 {strides = array<i32>} : memref<1x8x32xf32, #tpu.memory_space<vmem>>, vector<1x8x32xf32>,
    return
  }
  func.func @transform_0(%arg0: i32, %arg1: i32) -> (i32, i32) {
    %c0_i32 = arith.constant 0 : i32
    %c0_i32_0 = arith.constant 0 : i32
    return %arg1, %c0_i32 : i32, i32
  }
  func.func @transform_1(%arg0: i32, %arg1: i32) -> (i32, i32) {
    %c0_i32 = arith.constant 0 : i32
    %c0_i32_0 = arith.constant 0 : i32
    %c0_i32_1 = arith.constant 0 : i32
    return %c0_i32, %c0_i32_0 : i32, i32
  }
  func.func @transform_2(%arg0: i32, %arg1: i32) -> (i32, i32, i32) {
    %c0_i32 = arith.constant 0 : i32
    %c0_i32_0 = arith.constant 0 : i32
    %c0_i32_1 = arith.constant 0 : i32
    return %arg0, %c0_i32, %c0_i32_0 : i32, i32, i32
  }
  func.func @transform_3(%arg0: i32, %arg1: i32) -> (i32, i32, i32) {
    %c0_i32 = arith.constant 0 : i32
    %c0_i32_0 = arith.constant 0 : i32
    return %arg0, %arg1, %c0_i32 : i32, i32, i32
  }
}

</mosaic_0001>

<bundles_post_ra>
// kernel: tpu_custom_call.1
= control target key start
LH: loop header
LB: loop body
LE: loop exit
PB: predicated region body
PF: predicated region fallthrough
CT: control target
= control target key end

     0   :  { %8 = vsyncpa [#allocation4], 0  ;;  %s811_s0 = inlined_call_operand.vmem [shape: f32[8,16], index: 0, kind: input, shape index: {}]   ;;  %s812_s1 = inlined_call_operand.vmem [shape: f32[64,32], index: 1, kind: input, shape index: {}]   ;;  %s813_s2 = inlined_call_operand.vmem [shape: f32[2,16,64], index: 2, kind: input, shape index: {}]   ;;  %s814_s3 = inlined_call_operand.hbm [shape: f32[2,8,32], index: 3, kind: output, shape index: {}]  }
   0x1   :  { %10 = vsyncpa [#allocation4 + $0x1], 0  ;;  %s673_s12 = smov 0   ;;  %s675_s13 = smov 0  }
   0x2   :  { %s677_s14 = smov 0   ;;  %s679_s15 = smov 0  }
   0x3   :  { %s681_s16 = smov 0   ;;  %s683_s17 = smov 0  }
   0x4 LB: > { %s461_s18 = sadd.s32 4294967295, %s648_s17   ;;  %s462_s19 = sadd.s32 4294967294, %s648_s17   ;;  %s648_s17 = sphi %s683_s17, %s16_s17   ;;  %s644_s16 = sphi %s681_s16, %s821_s16   ;;  %s640_s15 = sphi %s679_s15, %s820_s15   ;;  %s636_s14 = sphi %s677_s14, %s819_s14   ;;  %s632_s13 = sphi %s675_s13, %s818_s13   ;;  %s628_s12 = sphi %s673_s12, %s817_s12  }
   0x5   : > { %s28_s20 = sadd.s32 1, %s644_s16  ;;  %s110_s21 = sadd.s32 1, %s636_s14 }
   0x6   : > { %p30_p0 = scmp.ge.s32.totalorder %s28_s20, 2  ;;  %p120_p1 = scmp.ne.s32.totalorder %s636_s14, %s632_s13 }
   0x7   : > { %p121_p2 = scmp.eq.s32.totalorder %s461_s18, 1  ;;  %p126_p3 = scmp.ne.s32.totalorder %s632_s13, %s628_s12 }
   0x8   : > { %s823_s20 = smov (%p30_p0, %s28_s20), 0  ;;  %p127_p5 = scmp.eq.s32.totalorder %s462_s19, 1 }
   0x9   : > { %p713_p4 = por %p121_p2, %p120_p1  ;;  %s105_s23 = ssub.s32 %s644_s16, %s823_s20 }
   0xa   : > { %p466_p6 = scmp.ge.s32.totalorder %s648_s17, 1  ;;  %p108_p7 = scmp.eq.s32.totalorder %s105_s23, 0 }
   0xb   : > { %p720_p8 = por %p127_p5, %p126_p3  ;;  %p163_p9 = scmp.lt.s32.totalorder %s648_s17, 3 }
   0xc   : > { %s726_s25 = scalar_select %p108_p7, %s636_s14, %s110_s21  }
   0xd   : > { %p164_p10 = pnand %p466_p6, %p163_p9 }
   0xe   : > { %p195_p11 = scmp.lt.s32.totalorder (!%p164_p10), %s640_s15, 1  ;;  %s188_s5 = sand.u32 (!%p164_p10), 1, %s632_s13  }
   0xf   : > { %167 = sbr.rel (%p164_p10) target bundleno = 436 (0x1b4), region = 32  ;;  %s467_s6 = sshll.u32 (!%p164_p10), %s188_s5, 3 }
  0x10   : > { %s473_s7 = sshll.u32 (!%p164_p10), %s640_s15, 7  ;;  %s190_s8 = scalar_lea.vmem (!%p164_p10), [#allocation3], %s467_s6 }
  0x11   : > { %s765_s18 = scalar_lea.hbm (!%p164_p10), %s814_s3, %s473_s7  ;;  %s364_s19 = scalar_lea.sflag (!%p164_p10), [#allocation4], %s188_s5 }
  0x14   : > { %v208_v0 = vld [vmem:[%s812_s1 + $0x38] sm:$0xff]  ;;  %v650_v1 = vmov 0.0   ;;  %vm651_vm0 = vmmov 0   ;;  %s196_s28 = scalar_select %p195_p11, %s640_s15, 1  ;;  %v207_v2 = vld [vmem:[%s812_s1 + $0x30] sm:$0xff]  ;;  %v206_v3 = vld [vmem:[%s812_s1 + $0x28] sm:$0xff] }
  0x15   : > { %489 = vmatprep.subr.mxu0 %v650_v1  ;;  %493 = vmatprep.mubr.msk.f32.mxu0 %vm651_vm0, %v650_v1  ;;  %v200_v6 = vld [vmem:[%s811_s0] sm:$0xff]  ;;  %vm211_vm1 = vcmask 130048   ;;  %v204_v8 = vld [vmem:[%s812_s1 + $0x18] sm:$0xff]  ;;  %v203_v9 = vld [vmem:[%s812_s1 + $0x10] sm:$0xff]  ;;  %vm285_vm2 = vcmask 523264   ;;  %vm361_vm3 = vcmask 261120  }
  0x16   : > { %496 = vmatprep.subr.mxu1 %v650_v1  ;;  %512 = vmatprep.mubr.msk.f32.mxu1 %vm651_vm0, %v650_v1  ;;  %s476_s4 = sshll.u32 %s196_s28, 4  ;;  %v205_v7 = vld [vmem:[%s812_s1 + $0x20] sm:$0xff]  ;;  %v202_v10 = vld [vmem:[%s812_s1 + $0x8] sm:$0xff]  ;;  %s652_s15 = smov [#allocation3]  }
  0x17   : > { %497 = vmatpush3.msra.mxu1 %v208_v0  ;;  %s199_s9 = scalar_lea.vmem %s813_s2, %s476_s4  ;;  %v201_v11 = vld [vmem:[%s812_s1] sm:$0xff]  ;;  %s576_s23 = sshll.u32 %s652_s15, 4  ;;  %s577_s23 = int_to_ptr.vmem [resolvable:$false] %s576_s23 }
  0x18   : > { %498 = vmatprep.subr.mxu1 %v650_v1  ;;  %v210_v4 = vld [vmem:[%s199_s9 + $0x8] sm:$0xff]  ;;  %v209_v5 = vld [vmem:[%s199_s9] sm:$0xff]  ;;  %s378_s9 = sshll.u32 %s190_s8, 4  ;;  %s578_s26 = scalar_lea.vmem %s577_s23, 256  ;;  %s767_s9 = int_to_ptr.vmem [resolvable:$true] %s378_s9 }
  0x19   : > { %499 = vmatpush3.msra.mxu1 %v207_v2  ;;  %490 = vmatpush3.msra.mxu0 %v210_v4  ;;  %s572_s21 = scalar_lea.vmem %s767_s9, 128  ;;  %p579_p1 = scmp.lt.s32.totalorder %s767_s9, %s577_s23 }
  0x1a   : > { %500 = vmatprep.subr.mxu1 %v650_v1  ;;  %491 = vmatprep.subr.mxu0 %v650_v1  ;;  %p573_p12 = scmp.ne.s32.totalorder %s767_s9, %s572_s21  ;;  %p580_p2 = scmp.lt.s32.totalorder %s578_s26, %s572_s21 }
  0x1b   : > { %501 = vmatpush3.msra.mxu1 %v206_v3  ;;  %492 = vmatpush3.msra.mxu0 %v209_v5 }
  0x1c   : > { %502 = vmatprep.subr.mxu1 %v650_v1  ;;  %494 = vmatmul.mubr.msk.f32.vlgmr.msra.gmra.mxu0 %vm211_vm1, %v200_v6  ;;  %p574_p13 = pnand %p573_p12, %p713_p4  ;;  %p581_p3 = por %p580_p2, %p579_p1 }
  0x1d   : > { %503 = vmatpush3.msra.mxu1 %v205_v7 }
  0x1e   : > { %504 = vmatprep.subr.mxu1 %v650_v1  ;;  %p575_p0 = pneg %p574_p13 }
  0x1f   : > { %505 = vmatpush3.msra.mxu1 %v204_v8 }
  0x20   : > { %506 = vmatprep.subr.mxu1 %v650_v1  ;;  %p582_p5 = pnand %p581_p3, %p575_p0 }
  0x21   : > { %507 = vmatpush3.msra.mxu1 %v203_v9 }
  0x22   : > { %508 = vmatprep.subr.mxu1 %v650_v1 }
  0x23   : > { %509 = vmatpush3.msra.mxu1 %v202_v10 }
  0x24   : > { %510 = vmatprep.subr.mxu1 %v650_v1 }
  0x25   : > { %511 = vmatpush3.msra.mxu1 %v201_v11 }
  0xdc   : > { %v281_v12 = vpop.f32.mrf.mxu0 }
  0xdd   : > { %286 = vst.msk [vmem:[#allocation2] sm:$0xff] %vm285_vm2, %v281_v12 }
  0xde   : > { %v495_v13 = vpop.f32.mrf.mxu0 }
  0xe4   : > { %v287_v14 = vld [vmem:[#allocation2] sm:$0xff] }
  0xe5   : > { %513 = vmatmul.mubr.msk.f32.vlgmr.msra.gmra.mxu1 %vm285_vm2, %v287_v14 }
 0x1a5   : > { %v357_v15 = vpop.f32.mrf.mxu1 }
 0x1a6   : > { %362 = vst.msk [vmem:[%s190_s8] sm:$0xff] %vm361_vm3, %v357_v15 }
 0x1a7   : > { %v514_v16 = vpop.f32.mrf.mxu1 }
 0x1a8   : > { %585 = shalt.err (!%p582_p5)
}
 0x1a9   : > { %s586_s27 = scalar_lea.hbm %s765_s18, 128  ;;  %s590_s30 = scalar_lea.hbm %s814_s3, 256 }
 0x1aa   : > { %p587_p6 = scmp.ne.s32.totalorder %s765_s18, %s586_s27  ;;  %p591_p10 = scmp.lt.s32.totalorder %s765_s18, %s814_s3 }
 0x1ab   : > { %p592_p11 = scmp.lt.s32.totalorder %s590_s30, %s586_s27 }
 0x1ac   : > { %p588_p7 = pnand %p587_p6, %p713_p4 }
 0x1ad   : > { %p593_p12 = por %p592_p11, %p591_p10 }
 0x1ae   : > { %p589_p9 = pneg %p588_p7 }
 0x1b0   : > { %p594_p13 = pnand %p593_p12, %p589_p9 }
 0x1b2   : > { %597 = shalt.err (!%p594_p13)
}
 0x1b3   : > { %515 = dma.vmem_to_hbm [thread:$0]  (%p713_p4), %s767_s9, 128, %s765_s18, %s364_s19  }
 0x1b4 PF: > { %p521_p0 = scmp.ge.s32.totalorder %s648_s17, 2  ;;  %s390_s6 = sand.u32 1, %s628_s12  }
 0x1b5   : > { %s391_s7 = scalar_lea.sflag [#allocation4], %s390_s6 }
 0x1b6   : > { %p518_p1 = pnand %p521_p0, %p720_p8 }
 0x1b8   : > { %p519_p2 = pneg %p518_p1 }
 0x1ba   : > { %623 = dma.done.wait (%p519_p2), %s391_s7, 128  }
 0x1bb   : > { %625 = vsyncadd (%p519_p2), %s391_s7, 4294967168  ;;  %s16_s17 = sadd.s32 1, %s648_s17   ;;  %s817_s12 = smov %s632_s13 }
 0x1bc   : > { %p13_p3 = scmp.ge.s32.totalorder %s16_s17, 4   ;;  %s818_s13 = smov %s636_s14 }
 0x1bd   : > { %s819_s14 = smov %s726_s25  ;;  %s820_s15 = smov %s644_s16 }
 0x1be   : > { %s821_s16 = smov %s823_s20  ;;  %15 = sbr.rel (!%p13_p3) target bundleno = 4 (0x4), region = 70 }
 0x1c3   :  { %396 = vsyncpa [#allocation4], 1 }
 0x1c4   :  { %398 = vsyncpa [#allocation4 + $0x1], 1 }

</bundles_post_ra>
